<compile_context>
chip_gen: v7x
topology: tpu7x:2x2x1
jax: 0.10.0
libtpu: 0.0.40
codegen_flags: <defaults>
</compile_context>

<pallas_src>
import math

import jax
import jax.numpy as jnp
from jax.experimental import pallas as pl
from jax.experimental.pallas import tpu as pltpu

# ----------------------------- model dims -----------------------------------
STATE_DIM = 11
ACTION_DIM = 3
HIDDEN_DIM = 32           # small demo width (PyTorch default is 256)
T_DIM = 16
BATCH = 8

SA_DIM = STATE_DIM + ACTION_DIM        # 14
SA_PAD = ((SA_DIM + 7) // 8) * 8       # 16  (pad so the packed weight rows stay 8-aligned)
HALF = T_DIM // 2                      # 8

# fused (two-head) layer widths
NT1 = 2 * (2 * T_DIM)                  # 64 : both heads' time-MLP hidden
NT2 = 2 * T_DIM                        # 32 : both heads' t_feat
NH = 2 * HIDDEN_DIM                    # 64 : both heads' mid hidden
NO = 2                                 # q1 | q2
WCOLS = max(NT1, NH)                   # 64 : lane width of the packed weight slab

# row offsets inside the packed weight slab (all multiples of 8)
R_WT1S = 0
R_WT1C = R_WT1S + HALF                 # 8
R_WT2 = R_WT1C + HALF                  # 16
R_W1SA = R_WT2 + NT1                   # 80
R_W1T = R_W1SA + SA_PAD                # 96
R_W2 = R_W1T + NT2                     # 128
R_W3 = R_W2 + NH                       # 192
R_WF = R_W3 + NH                       # 256
R_TOT = R_WF + NH                      # 320


def _mish(x):
    # mish(x) = x * tanh(softplus(x)) = x * n / (n + 2) with n = e*(e+2), e = exp(x).
    # Clamp the exp argument so n stays finite (for x >= 30, n/(n+2) == 1 in f32).
    e = jnp.exp(jnp.minimum(x, 30.0))
    n = e * (e + 2.0)
    return x * n / (n + 2.0)


# ------------------------------ fused Pallas kernel ---------------------------
def fused_q_kernel(sa_ref, t_ref, freqs_ref, w_ref, b_ref, out_ref):
    f32 = jnp.float32

    # --- SinusoidalPosEmb: freqs precomputed; no in-kernel sin/cos concat ------
    # emb @ Wt1 == sin(ang) @ Wt1[:half] + cos(ang) @ Wt1[half:]
    ang = t_ref[...] * freqs_ref[...]                              # (B,1)*(1,half)->(B,half)
    s = jnp.sin(ang)
    c = jnp.cos(ang)

    # --- time_mlp layer 1 (both heads side by side on lanes) -------------------
    h = (jnp.dot(s, w_ref[R_WT1S:R_WT1S + HALF, :NT1], preferred_element_type=f32)
         + jnp.dot(c, w_ref[R_WT1C:R_WT1C + HALF, :NT1], preferred_element_type=f32)
         + b_ref[0:1, :NT1])
    h = _mish(h)                                                   # (B, 64)

    # --- time_mlp layer 2 (block-diagonal -> heads stay independent) -----------
    t_feat = (jnp.dot(h, w_ref[R_WT2:R_WT2 + NT1, :NT2], preferred_element_type=f32)
              + b_ref[1:2, :NT2])                                  # (B, 32)

    # --- mid layer 1: cat([sa, t_feat]) @ W1 == sa @ W1_sa + t_feat @ W1_t ------
    x = (jnp.dot(sa_ref[...], w_ref[R_W1SA:R_W1SA + SA_PAD, :NH], preferred_element_type=f32)
         + jnp.dot(t_feat, w_ref[R_W1T:R_W1T + NT2, :NH], preferred_element_type=f32)
         + b_ref[2:3, :NH])
    x = _mish(x)                                                   # (B, 64)

    # --- mid layers 2, 3 (block-diagonal) ---------------------------------------
    x = _mish(jnp.dot(x, w_ref[R_W2:R_W2 + NH, :NH], preferred_element_type=f32)
              + b_ref[3:4, :NH])
    x = _mish(jnp.dot(x, w_ref[R_W3:R_W3 + NH, :NH], preferred_element_type=f32)
              + b_ref[4:5, :NH])

    # --- final layer (block-diag (64,2)): lane 0 = q1, lane 1 = q2 --------------
    out_ref[...] = (jnp.dot(x, w_ref[R_WF:R_WF + NH, :NO], preferred_element_type=f32)
                    + b_ref[5:6, :NO])


# ------------------------- param packing (wrapper-side) -----------------------
def _block_diag(a, b):
    ra, ca = a.shape
    rb, cb = b.shape
    z = jnp.zeros((ra + rb, ca + cb), jnp.float32)
    return z.at[:ra, :ca].set(a).at[ra:, ca:].set(b)


def _pack_params(q1_params, q2_params):
    """Pack both heads into one weight slab (R_TOT, WCOLS) and one bias slab (8, WCOLS)."""
    (wt1a, bt1a, wt2a, bt2a, w1a, b1a, w2a, b2a, w3a, b3a, wfa, bfa) = q1_params
    (wt1b, bt1b, wt2b, bt2b, w1b, b1b, w2b, b2b, w3b, b3b, wfb, bfb) = q2_params

    # shared-input layers -> concatenate heads along output lanes
    wt1s = jnp.concatenate([wt1a[:HALF], wt1b[:HALF]], axis=1)        # (half, 64)
    wt1c = jnp.concatenate([wt1a[HALF:], wt1b[HALF:]], axis=1)        # (half, 64)
    w1sa = jnp.concatenate([w1a[:SA_DIM], w1b[:SA_DIM]], axis=1)      # (14, 64)
    w1sa = jnp.pad(w1sa, ((0, SA_PAD - SA_DIM), (0, 0)))              # (16, 64)

    # per-head-input layers -> block diagonal (heads stay independent)
    wt2 = _block_diag(wt2a, wt2b)                                     # (64, 32)
    w1t = _block_diag(w1a[SA_DIM:], w1b[SA_DIM:])                     # (32, 64)
    w2 = _block_diag(w2a, w2b)                                        # (64, 64)
    w3 = _block_diag(w3a, w3b)                                        # (64, 64)
    wf = _block_diag(wfa, wfb)                                        # (64, 2)

    W = jnp.zeros((R_TOT, WCOLS), jnp.float32)
    W = W.at[R_WT1S:R_WT1S + HALF, :NT1].set(wt1s)
    W = W.at[R_WT1C:R_WT1C + HALF, :NT1].set(wt1c)
    W = W.at[R_WT2:R_WT2 + NT1, :NT2].set(wt2)
    W = W.at[R_W1SA:R_W1SA + SA_PAD, :NH].set(w1sa)
    W = W.at[R_W1T:R_W1T + NT2, :NH].set(w1t)
    W = W.at[R_W2:R_W2 + NH, :NH].set(w2)
    W = W.at[R_W3:R_W3 + NH, :NH].set(w3)
    W = W.at[R_WF:R_WF + NH, :NO].set(wf)

    Bv = jnp.zeros((8, WCOLS), jnp.float32)
    Bv = Bv.at[0, :NT1].set(jnp.concatenate([bt1a[0], bt1b[0]]))
    Bv = Bv.at[1, :NT2].set(jnp.concatenate([bt2a[0], bt2b[0]]))
    Bv = Bv.at[2, :NH].set(jnp.concatenate([b1a[0], b1b[0]]))
    Bv = Bv.at[3, :NH].set(jnp.concatenate([b2a[0], b2b[0]]))
    Bv = Bv.at[4, :NH].set(jnp.concatenate([b3a[0], b3b[0]]))
    Bv = Bv.at[5, :NO].set(jnp.concatenate([bfa[0], bfb[0]]))
    return W, Bv


def noisy_critic_forward(state, action, t, q1_params, q2_params):
    """NoisyCritic.forward: returns (q1, q2), each (B, 1)."""
    B = state.shape[0]
    sa = jnp.concatenate(
        [state.astype(jnp.float32), action.astype(jnp.float32),
         jnp.zeros((B, SA_PAD - SA_DIM), jnp.float32)], axis=-1)         # (B, 16)
    t2d = t.reshape(B, 1).astype(jnp.float32)                            # (B, 1)
    scale = -math.log(10000.0) / (HALF - 1)
    freqs = jnp.exp(jnp.arange(HALF, dtype=jnp.float32) * scale).reshape(1, HALF)

    W, Bv = _pack_params(q1_params, q2_params)

    vmem = pl.BlockSpec(memory_space=pltpu.MemorySpace.VMEM)
    out = pl.pallas_call(
        fused_q_kernel,
        out_shape=jax.ShapeDtypeStruct((B, NO), jnp.float32),
        in_specs=[vmem, vmem, vmem, vmem, vmem],
        out_specs=vmem,
    )(sa, t2d, freqs, W, Bv)

    return out[:, 0:1], out[:, 1:2]


# ------------------------- deterministic param init ---------------------------
def init_q_params(key):
    input_dim = STATE_DIM + ACTION_DIM + T_DIM
    shapes = [
        (T_DIM, 2 * T_DIM), (1, 2 * T_DIM),          # time_mlp Linear 1
        (2 * T_DIM, T_DIM), (1, T_DIM),              # time_mlp Linear 2
        (input_dim, HIDDEN_DIM), (1, HIDDEN_DIM),    # mid_layer Linear 1
        (HIDDEN_DIM, HIDDEN_DIM), (1, HIDDEN_DIM),   # mid_layer Linear 2
        (HIDDEN_DIM, HIDDEN_DIM), (1, HIDDEN_DIM),   # mid_layer Linear 3
        (HIDDEN_DIM, 1), (1, 1),                     # final_layer
    ]
    keys = jax.random.split(key, len(shapes))
    params = []
    for k, s in zip(keys, shapes):
        fan_in = s[0] if s[0] > 1 else s[1]
        scale = 1.0 / math.sqrt(fan_in)
        params.append(jax.random.uniform(k, s, jnp.float32, -scale, scale))
    return tuple(params)


# --------------------------- pure-JAX reference --------------------------------
def q_function_ref(state, action, t, params):
    (wt1, bt1, wt2, bt2, w1, b1, w2, b2, w3, b3, wf, bf) = params
    scale = -math.log(10000.0) / (HALF - 1)
    freqs = jnp.exp(jnp.arange(HALF, dtype=jnp.float32) * scale)
    ang = t[:, None] * freqs[None, :]
    emb = jnp.concatenate([jnp.sin(ang), jnp.cos(ang)], axis=-1)

    def mish(x):
        return x * jnp.tanh(jax.nn.softplus(x))

    h = mish(emb @ wt1 + bt1)
    t_feat = h @ wt2 + bt2
    x = jnp.concatenate([state, action, t_feat], axis=-1)
    x = mish(x @ w1 + b1)
    x = mish(x @ w2 + b2)
    x = mish(x @ w3 + b3)
    return x @ wf + bf


# ----------------------------------- main --------------------------------------
if __name__ == "__main__":
    key = jax.random.PRNGKey(0)
    k_s, k_a, k_t, k_p1, k_p2 = jax.random.split(key, 5)

    state = jax.random.normal(k_s, (BATCH, STATE_DIM), jnp.float32)
    action = jax.random.normal(k_a, (BATCH, ACTION_DIM), jnp.float32)
    t = jax.random.randint(k_t, (BATCH,), 0, 100).astype(jnp.float32)

    q1_params = init_q_params(k_p1)
    q2_params = init_q_params(k_p2)

    q1, q2 = noisy_critic_forward(state, action, t, q1_params, q2_params)
    jax.block_until_ready((q1, q2))

    # correctness check against pure-JAX reference
    q1_ref = q_function_ref(state, action, t, q1_params)
    q2_ref = q_function_ref(state, action, t, q2_params)
    assert q1.shape == (BATCH, 1) and q2.shape == (BATCH, 1)
    assert jnp.allclose(q1, q1_ref, atol=1e-4, rtol=1e-4)
    assert jnp.allclose(q2, q2_ref, atol=1e-4, rtol=1e-4)

    print("KERNEL_OK")
</pallas_src>

<mosaic_0001>
module attributes {stable_mosaic.version = 11 : i64} {
  func.func @fused_q_kernel(%arg0: memref<8x16xf32, #tpu.memory_space<vmem>>, %arg1: memref<8x1xf32, #tpu.memory_space<vmem>>, %arg2: memref<1x8xf32, #tpu.memory_space<vmem>>, %arg3: memref<320x64xf32, #tpu.memory_space<vmem>>, %arg4: memref<8x64xf32, #tpu.memory_space<vmem>>, %arg5: memref<8x2xf32, #tpu.memory_space<vmem>>) attributes {dimension_semantics = [], scalar_prefetch = 0 : i64, scratch_operands = 0 : i64, tpu.core_type = #tpu.core_type<tc>} {
    %c0 = arith.constant 0 : index
    %c0_0 = arith.constant 0 : index
    %0 = vector.load %arg1[%c0, %c0_0] : memref<8x1xf32, #tpu.memory_space<vmem>>, vector<8x1xf32>
    %c0_1 = arith.constant 0 : index
    %c0_2 = arith.constant 0 : index
    %1 = vector.load %arg2[%c0_1, %c0_2] : memref<1x8xf32, #tpu.memory_space<vmem>>, vector<1x8xf32>
    %2 = vector.broadcast %0 : vector<8x1xf32> to vector<8x8xf32>
    %3 = vector.broadcast %1 : vector<1x8xf32> to vector<8x8xf32>
    %4 = arith.mulf %2, %3 : vector<8x8xf32>
    %5 = math.sin %4 : vector<8x8xf32>
    %6 = math.cos %4 : vector<8x8xf32>
    %c0_3 = arith.constant 0 : index
    %c0_4 = arith.constant 0 : index
    %7 = vector.load %arg3[%c0_3, %c0_4] : memref<320x64xf32, #tpu.memory_space<vmem>>, vector<8x64xf32>
    %cst = arith.constant dense<0.000000e+00> : vector<8x64xf32>
    %8 = tpu.matmul %5, %7, %cst {dimension_numbers = #tpu.dot_dimension_numbers<[1], [0], [0], [1], [0, 0, 1, 1], [], []>} : vector<8x8xf32>, vector<8x64xf32>, vector<8x64xf32> -> vector<8x64xf32>
    %c8 = arith.constant 8 : index
    %c0_5 = arith.constant 0 : index
    %9 = vector.load %arg3[%c8, %c0_5] : memref<320x64xf32, #tpu.memory_space<vmem>>, vector<8x64xf32>
    %cst_6 = arith.constant dense<0.000000e+00> : vector<8x64xf32>
    %10 = tpu.matmul %6, %9, %cst_6 {dimension_numbers = #tpu.dot_dimension_numbers<[1], [0], [0], [1], [0, 0, 1, 1], [], []>} : vector<8x8xf32>, vector<8x64xf32>, vector<8x64xf32> -> vector<8x64xf32>
    %11 = arith.addf %8, %10 : vector<8x64xf32>
    %c0_7 = arith.constant 0 : index
    %c0_8 = arith.constant 0 : index
    %12 = vector.load %arg4[%c0_7, %c0_8] : memref<8x64xf32, #tpu.memory_space<vmem>>, vector<1x64xf32>
    %13 = vector.broadcast %12 : vector<1x64xf32> to vector<8x64xf32>
    %14 = arith.addf %11, %13 : vector<8x64xf32>
    %cst_9 = arith.constant 3.000000e+01 : f32
    %15 = vector.broadcast %cst_9 : f32 to vector<8x64xf32>
    %16 = arith.minimumf %14, %15 : vector<8x64xf32>
    %17 = math.exp %16 : vector<8x64xf32>
    %cst_10 = arith.constant 2.000000e+00 : f32
    %18 = vector.broadcast %cst_10 : f32 to vector<8x64xf32>
    %19 = arith.addf %17, %18 : vector<8x64xf32>
    %20 = arith.mulf %17, %19 : vector<8x64xf32>
    %21 = arith.mulf %14, %20 : vector<8x64xf32>
    %cst_11 = arith.constant 2.000000e+00 : f32
    %22 = vector.broadcast %cst_11 : f32 to vector<8x64xf32>
    %23 = arith.addf %20, %22 : vector<8x64xf32>
    %24 = arith.divf %21, %23 : vector<8x64xf32>
    %c16 = arith.constant 16 : index
    %c0_12 = arith.constant 0 : index
    %25 = vector.load %arg3[%c16, %c0_12] : memref<320x64xf32, #tpu.memory_space<vmem>>, vector<64x32xf32>
    %cst_13 = arith.constant dense<0.000000e+00> : vector<8x32xf32>
    %26 = tpu.matmul %24, %25, %cst_13 {dimension_numbers = #tpu.dot_dimension_numbers<[1], [0], [0], [1], [0, 0, 1, 1], [], []>} : vector<8x64xf32>, vector<64x32xf32>, vector<8x32xf32> -> vector<8x32xf32>
    %c1 = arith.constant 1 : index
    %c0_14 = arith.constant 0 : index
    %27 = vector.load %arg4[%c1, %c0_14] : memref<8x64xf32, #tpu.memory_space<vmem>>, vector<1x32xf32>
    %28 = vector.broadcast %27 : vector<1x32xf32> to vector<8x32xf32>
    %29 = arith.addf %26, %28 : vector<8x32xf32>
    %c0_15 = arith.constant 0 : index
    %c0_16 = arith.constant 0 : index
    %30 = vector.load %arg0[%c0_15, %c0_16] : memref<8x16xf32, #tpu.memory_space<vmem>>, vector<8x16xf32>
    %c80 = arith.constant 80 : index
    %c0_17 = arith.constant 0 : index
    %31 = vector.load %arg3[%c80, %c0_17] : memref<320x64xf32, #tpu.memory_space<vmem>>, vector<16x64xf32>
    %cst_18 = arith.constant dense<0.000000e+00> : vector<8x64xf32>
    %32 = tpu.matmul %30, %31, %cst_18 {dimension_numbers = #tpu.dot_dimension_numbers<[1], [0], [0], [1], [0, 0, 1, 1], [], []>} : vector<8x16xf32>, vector<16x64xf32>, vector<8x64xf32> -> vector<8x64xf32>
    %c96 = arith.constant 96 : index
    %c0_19 = arith.constant 0 : index
    %33 = vector.load %arg3[%c96, %c0_19] : memref<320x64xf32, #tpu.memory_space<vmem>>, vector<32x64xf32>
    %cst_20 = arith.constant dense<0.000000e+00> : vector<8x64xf32>
    %34 = tpu.matmul %29, %33, %cst_20 {dimension_numbers = #tpu.dot_dimension_numbers<[1], [0], [0], [1], [0, 0, 1, 1], [], []>} : vector<8x32xf32>, vector<32x64xf32>, vector<8x64xf32> -> vector<8x64xf32>
    %35 = arith.addf %32, %34 : vector<8x64xf32>
    %c2 = arith.constant 2 : index
    %c0_21 = arith.constant 0 : index
    %36 = vector.load %arg4[%c2, %c0_21] : memref<8x64xf32, #tpu.memory_space<vmem>>, vector<1x64xf32>
    %37 = vector.broadcast %36 : vector<1x64xf32> to vector<8x64xf32>
    %38 = arith.addf %35, %37 : vector<8x64xf32>
    %cst_22 = arith.constant 3.000000e+01 : f32
    %39 = vector.broadcast %cst_22 : f32 to vector<8x64xf32>
    %40 = arith.minimumf %38, %39 : vector<8x64xf32>
    %41 = math.exp %40 : vector<8x64xf32>
    %cst_23 = arith.constant 2.000000e+00 : f32
    %42 = vector.broadcast %cst_23 : f32 to vector<8x64xf32>
    %43 = arith.addf %41, %42 : vector<8x64xf32>
    %44 = arith.mulf %41, %43 : vector<8x64xf32>
    %45 = arith.mulf %38, %44 : vector<8x64xf32>
    %cst_24 = arith.constant 2.000000e+00 : f32
    %46 = vector.broadcast %cst_24 : f32 to vector<8x64xf32>
    %47 = arith.addf %44, %46 : vector<8x64xf32>
    %48 = arith.divf %45, %47 : vector<8x64xf32>
    %c128 = arith.constant 128 : index
    %c0_25 = arith.constant 0 : index
    %49 = vector.load %arg3[%c128, %c0_25] : memref<320x64xf32, #tpu.memory_space<vmem>>, vector<64x64xf32>
    %cst_26 = arith.constant dense<0.000000e+00> : vector<8x64xf32>
    %50 = tpu.matmul %48, %49, %cst_26 {dimension_numbers = #tpu.dot_dimension_numbers<[1], [0], [0], [1], [0, 0, 1, 1], [], []>} : vector<8x64xf32>, vector<64x64xf32>, vector<8x64xf32> -> vector<8x64xf32>
    %c3 = arith.constant 3 : index
    %c0_27 = arith.constant 0 : index
    %51 = vector.load %arg4[%c3, %c0_27] : memref<8x64xf32, #tpu.memory_space<vmem>>, vector<1x64xf32>
    %52 = vector.broadcast %51 : vector<1x64xf32> to vector<8x64xf32>
    %53 = arith.addf %50, %52 : vector<8x64xf32>
    %cst_28 = arith.constant 3.000000e+01 : f32
    %54 = vector.broadcast %cst_28 : f32 to vector<8x64xf32>
    %55 = arith.minimumf %53, %54 : vector<8x64xf32>
    %56 = math.exp %55 : vector<8x64xf32>
    %cst_29 = arith.constant 2.000000e+00 : f32
    %57 = vector.broadcast %cst_29 : f32 to vector<8x64xf32>
    %58 = arith.addf %56, %57 : vector<8x64xf32>
    %59 = arith.mulf %56, %58 : vector<8x64xf32>
    %60 = arith.mulf %53, %59 : vector<8x64xf32>
    %cst_30 = arith.constant 2.000000e+00 : f32
    %61 = vector.broadcast %cst_30 : f32 to vector<8x64xf32>
    %62 = arith.addf %59, %61 : vector<8x64xf32>
    %63 = arith.divf %60, %62 : vector<8x64xf32>
    %c192 = arith.constant 192 : index
    %c0_31 = arith.constant 0 : index
    %64 = vector.load %arg3[%c192, %c0_31] : memref<320x64xf32, #tpu.memory_space<vmem>>, vector<64x64xf32>
    %cst_32 = arith.constant dense<0.000000e+00> : vector<8x64xf32>
    %65 = tpu.matmul %63, %64, %cst_32 {dimension_numbers = #tpu.dot_dimension_numbers<[1], [0], [0], [1], [0, 0, 1, 1], [], []>} : vector<8x64xf32>, vector<64x64xf32>, vector<8x64xf32> -> vector<8x64xf32>
    %c4 = arith.constant 4 : index
    %c0_33 = arith.constant 0 : index
    %66 = vector.load %arg4[%c4, %c0_33] : memref<8x64xf32, #tpu.memory_space<vmem>>, vector<1x64xf32>
    %67 = vector.broadcast %66 : vector<1x64xf32> to vector<8x64xf32>
    %68 = arith.addf %65, %67 : vector<8x64xf32>
    %cst_34 = arith.constant 3.000000e+01 : f32
    %69 = vector.broadcast %cst_34 : f32 to vector<8x64xf32>
    %70 = arith.minimumf %68, %69 : vector<8x64xf32>
    %71 = math.exp %70 : vector<8x64xf32>
    %cst_35 = arith.constant 2.000000e+00 : f32
    %72 = vector.broadcast %cst_35 : f32 to vector<8x64xf32>
    %73 = arith.addf %71, %72 : vector<8x64xf32>
    %74 = arith.mulf %71, %73 : vector<8x64xf32>
    %75 = arith.mulf %68, %74 : vector<8x64xf32>
    %cst_36 = arith.constant 2.000000e+00 : f32
    %76 = vector.broadcast %cst_36 : f32 to vector<8x64xf32>
    %77 = arith.addf %74, %76 : vector<8x64xf32>
    %78 = arith.divf %75, %77 : vector<8x64xf32>
    %c256 = arith.constant 256 : index
    %c0_37 = arith.constant 0 : index
    %79 = vector.load %arg3[%c256, %c0_37] : memref<320x64xf32, #tpu.memory_space<vmem>>, vector<64x2xf32>
    %cst_38 = arith.constant dense<0.000000e+00> : vector<8x2xf32>
    %80 = tpu.matmul %78, %79, %cst_38 {dimension_numbers = #tpu.dot_dimension_numbers<[1], [0], [0], [1], [0, 0, 1, 1], [], []>} : vector<8x64xf32>, vector<64x2xf32>, vector<8x2xf32> -> vector<8x2xf32>
    %c5 = arith.constant 5 : index
    %c0_39 = arith.constant 0 : index
    %81 = vector.load %arg4[%c5, %c0_39] : memref<8x64xf32, #tpu.memory_space<vmem>>, vector<1x2xf32>
    %82 = vector.broadcast %81 : vector<1x2xf32> to vector<8x2xf32>
    %83 = arith.addf %80, %82 : vector<8x2xf32>
    %c0_40 = arith.constant 0 : index
    %c0_41 = arith.constant 0 : index
    %84 = vector.load %arg5[%c0_40, %c0_41] : memref<8x2xf32, #tpu.memory_space<vmem>>, vector<8x2xf32>
    tpu.vector_store %arg5[%c0_40, %c0_41], %83 {strides = array<i32>} : memref<8x2xf32, #tpu.memory_space<vmem>>, vector<8x2xf32>,
    return
  }
}

</mosaic_0001>

<bundles_post_ra>
// kernel: tpu_custom_call.1
= control target key start
LH: loop header
LB: loop body
LE: loop exit
PB: predicated region body
PF: predicated region fallthrough
CT: control target
= control target key end

     0   :  { %v1211_v0 = vmov 0   ;;  %v1212_v2 = vmov 0.0   ;;  %vm1213_vm0 = vmmov 0   ;;  %v1214_v18 = vmov 683565275   ;;  %s1465_s1 = inlined_call_operand.vmem [shape: f32[8,1], index: 1, kind: input, shape index: {}]   ;;  %s1466_s3 = inlined_call_operand.vmem [shape: f32[320,64], index: 3, kind: input, shape index: {}]   ;;  %s1467_s2 = inlined_call_operand.vmem [shape: f32[1,8], index: 2, kind: input, shape index: {}]   ;;  %s1468_s4 = inlined_call_operand.vmem [shape: f32[8,64], index: 4, kind: input, shape index: {}]   ;;  %s1469_s0 = inlined_call_operand.vmem [shape: f32[8,16], index: 0, kind: input, shape index: {}]   ;;  %s1470_s5 = inlined_call_operand.vmem [shape: f32[8,2], index: 5, kind: output, shape index: {}]  }
   0x1   :  { %1190 = vset.pattern.permute.xlu0 %v1211_v0  ;;  %v20_v1 = vld [vmem:[%s1465_s1] sm:$0xff]  ;;  %1015 = vmatprep.subr.mxu0 %v1212_v2  ;;  %v242_v3 = vld [vmem:[%s1466_s3 + $0x8] sm:$0xff]  ;;  %v1215_v20 = vmov 2475754826   ;;  %v1216_v23 = vmov 2131351028  }
   0x2   :  { %24 = vperm.xlu0 %1190, %v20_v1   ;;  %1020 = vmatprep.subr.mxu1 %v1212_v2  ;;  %v241_v4 = vld [vmem:[%s1466_s3] sm:$0xff]  ;;  %v1217_v26 = vmov 2102212464   ;;  %v1218_v29 = vmov 920167782   ;;  %vm243_vm11 = vcmask 64512  }
   0x3   :  { %1016 = vmatpush3.msra.mxu0 %v242_v3  ;;  %1017 = vmatprep.mubr.msk.f32.mxu0 %vm1213_vm0, %v1212_v2  ;;  %v944_v5 = vld [vmem:[%s1467_s2] ss:$0 sm:$0xff]  ;;  %v1219_v32 = vmov 1326507024  }
   0x4   :  { %1021 = vmatpush3.msra.mxu1 %v241_v4  ;;  %1022 = vmatprep.mubr.msk.f32.mxu1 %vm1213_vm0, %v1212_v2 }
  0x81   :  { %v25_v6 = vpop.permute.xlu0 %24 }
  0x82   :  { %v1269_v7 = vmul.f32 %v944_v5, %v25_v6 }
  0x84   :  { %v37_v8 = vand.u32 2139095040, %v1269_v7  ;;  %v34_v12 = vand.u32 2147483647, %v1269_v7  ;;  %vm36_vm8 = vcmp.lt.s32.totalorder %v1269_v7, 0 }
  0x86   :  { %v38_v9 = vshrl.u32 %v37_v8, 23  ;;  %v41_v15 = vand.u32 8388607, %v34_v12  ;;  %vm35_vm9 = vcmp.le.f32.partialorder %v34_v12, 0.7853982 }
  0x88   :  { %v945_v10 = vadd.s32 4294967169, %v38_v9  ;;  %v42_v34 = vor.u32 8388608, %v41_v15 }
  0x8a   :  { %v44_v11 = vadd.s32 1, %v945_v10  ;;  %v82_v48 = vshll.u32 %v42_v34, 8 }
  0x8c   :  { %vm45_vm1 = vcmp.gt.s32.totalorder %v44_v11, 0 }
  0x8d   :  { %v46_v13 = vsel %vm45_vm1, %v44_v11, 0 }
  0x8e   :  { %v48_v14 = vand.u32 31, %v46_v13  ;;  %v47_v17 = vshrl.u32 %v46_v13, 5 }
  0x90   :  { %v49_v16 = vsub.s32 32, %v48_v14  ;;  %v51_v19 = vshll.u32 %v1214_v18, %v48_v14  ;;  %v54_v21 = vshll.u32 %v1215_v20, %v48_v14  ;;  %v57_v25 = vshll.u32 %v1216_v23, %v48_v14 }
  0x91   :  { %v60_v28 = vshll.u32 %v1217_v26, %v48_v14  ;;  %v63_v31 = vshll.u32 %v1218_v29, %v48_v14  ;;  %vm66_vm2 = vcmp.lt.s32.totalorder %v47_v17, 1  ;;  %vm69_vm3 = vcmp.lt.s32.totalorder %v47_v17, 4 }
  0x92   :  { %v52_v22 = vshrl.u32 %v1215_v20, %v49_v16  ;;  %v55_v24 = vshrl.u32 %v1216_v23, %v49_v16  ;;  %v58_v27 = vshrl.u32 %v1217_v26, %v49_v16  ;;  %v61_v30 = vshrl.u32 %v1218_v29, %v49_v16 }
  0x93   :  { %v64_v33 = vshrl.u32 %v1219_v32, %v49_v16  ;;  %v50_v43 = vshrl.u32 %v1214_v18, %v49_v16  ;;  %vm68_vm4 = vcmp.lt.s32.totalorder %v47_v17, 3  ;;  %vm67_vm5 = vcmp.lt.s32.totalorder %v47_v17, 2 }
  0x94   :  { %v53_v35 = vor.u32 %v52_v22, %v51_v19  ;;  %v56_v36 = vor.u32 %v55_v24, %v54_v21  ;;  %v59_v37 = vor.u32 %v58_v27, %v57_v25  ;;  %v62_v38 = vor.u32 %v61_v30, %v60_v28 }
  0x95   :  { %v65_v39 = vor.u32 %v64_v33, %v63_v31 }
  0x96   :  { %v71_v40 = vsel %vm69_vm3, %v59_v37, 2102212464  ;;  %v74_v41 = vsel %vm66_vm2, %v53_v35, %v56_v36  ;;  %v78_v42 = vsel %vm66_vm2, %v56_v36, %v59_v37  ;;  %v75_v44 = vsel %vm69_vm3, %v62_v38, 920167782 }
  0x97   :  { %v79_v45 = vsel %vm69_vm3, %v65_v39, 1326507024  ;;  %v76_v46 = vsel %vm68_vm4, %v59_v37, %v75_v44  ;;  %v70_v49 = vsel %vm66_vm2, %v50_v43, %v53_v35  ;;  %v72_v50 = vsel %vm68_vm4, %v56_v36, %v71_v40 }
  0x98   :  { %v80_v47 = vsel %vm68_vm4, %v62_v38, %v79_v45  ;;  %v77_v51 = vsel %vm67_vm5, %v74_v41, %v76_v46  ;;  %v73_v57 = vsel %vm67_vm5, %v70_v49, %v72_v50  ;;  %vm126_vm2 = vweird.f32 %v1269_v7  ;;  %v407_v45 = vld [vmem:[%s1466_s3 + $0x20] sm:$0xff]  ;;  %v408_v46 = vld [vmem:[%s1466_s3 + $0x28] sm:$0xff]  ;;  %v410_v49 = vld [vmem:[%s1466_s3 + $0x38] sm:$0xff] }
  0x99   :  { %v81_v52 = vsel %vm67_vm5, %v78_v42, %v80_v47  ;;  %v1278_v55 = vmul.u32.u64.low %v82_v48, %v77_v51  ;;  %v1279_v56 = vmul.u32.u64.high %v82_v48, %v77_v51, %v1278_v55  ;;  %v89_v59 = vmul.u32 %v82_v48, %v73_v57  ;;  %v405_v42 = vld [vmem:[%s1466_s3 + $0x10] sm:$0xff]  ;;  %v411_v51 = vld [vmem:[%s1466_s3 + $0x40] sm:$0xff] }
  0x9a   :  { %v1275_v53 = vmul.u32.u64.low %v82_v48, %v81_v52  ;;  %v1276_v54 = vmul.u32.u64.high %v82_v48, %v81_v52, %v1275_v53  ;;  %v1220_v44 = vmov 0.0|0.0   ;;  %v1123_v47 = vpack.c.bf16 %v408_v46, %v407_v45  ;;  %v409_v48 = vld [vmem:[%s1466_s3 + $0x30] sm:$0xff]  ;;  %v412_v52 = vld [vmem:[%s1466_s3 + $0x48] sm:$0xff] }
  0x9b   :  { %v92_v58 = vadd.s32 1, %v1279_v56  ;;  %1119 = vmatprep.subr.bf16.mxu0 %v1220_v44  ;;  %1137 = vmatprep.subr.bf16.mxu1 %v1220_v44  ;;  %v1126_v50 = vpack.c.bf16 %v410_v49, %v409_v48  ;;  %v1129_v53 = vpack.c.bf16 %v412_v52, %v411_v51  ;;  %vm418_vm3 = vcmask 523264   ;;  %v758_v51 = vld [vmem:[%s1466_s3 + $0xc8] sm:$0xff] }
  0x9c   :  { %vm91_vm6 = vc.u32 %v1276_v54, %v1278_v55  ;;  %v90_v9 = vadd.s32 %v1278_v55, %v1276_v54  ;;  %v493_v54 = vld [vmem:[%s1466_s3 + $0x50] sm:$0xff]  ;;  %v494_v55 = vld [vmem:[%s1466_s3 + $0x58] sm:$0xff]  ;;  %vm573_vm4 = vcmask 130048   ;;  %vm499_vm5 = vcmask 261120  }
  0x9d   :  { %v93_v60 = vsel %vm91_vm6, %v92_v58, %v1279_v56  ;;  %v1138_v56 = vpack.c.bf16 %v494_v55, %v493_v54  ;;  %v761_v55 = vld [vmem:[%s1466_s3 + $0xe0] sm:$0xff] }
  0x9e   :  { %v94_v61 = vadd.s32 %v93_v60, %v89_v59  ;;  %v955_v59 = vld [vmem:[%s1468_s4] ss:$0 sm:$0xff] }
  0xa0   :  { %v95_v62 = vadd.s32 536870912, %v94_v61 }
  0xa2   :  { %v96_v63 = vshrl.u32 %v95_v62, 30 }
  0xa4   :  { %v97_v0 = vshll.u32 %v96_v63, 30  ;;  %v120_v22 = vsub.s32 4, %v96_v63 }
  0xa6   :  { %v98_v1 = vsub.s32 %v94_v61, %v97_v0  ;;  %v121_v25 = vsel %vm36_vm8, %v120_v22, %v96_v63 }
  0xa7   :  { %v123_v27 = vsel %vm35_vm9, 0, %v121_v25  ;;  %v662_v25 = vld [vmem:[%s1466_s3 + $0x80] sm:$0xff] }
  0xa8   :  { %v100_v3 = vsub.s32 0, %v98_v1  ;;  %v127_v28 = vadd.s32 3, %v123_v27  ;;  %v231_v29 = vand.u32 3, %v123_v27 }
  0xaa   :  { %v946_v4 = vmin.u32 %v100_v3, %v98_v1  ;;  %v128_v30 = vand.u32 3, %v127_v28  ;;  %vm236_vm10 = vcmp.eq.s32.totalorder %v231_v29, 2  ;;  %vm233_vm13 = vcmp.eq.s32.totalorder %v231_v29, 0  ;;  %v664_v28 = vld [vmem:[%s1466_s3 + $0x90] sm:$0xff] }
  0xab   :  { %vm232_vm15 = vcmp.lt.s32.totalorder %v231_v29, 2  ;;  %v665_v29 = vld [vmem:[%s1466_s3 + $0x98] sm:$0xff] }
  0xac   :  { %v102_v5 = vclz %v946_v4  ;;  %vm133_vm12 = vcmp.eq.s32.totalorder %v128_v30, 2  ;;  %vm130_vm14 = vcmp.eq.s32.totalorder %v128_v30, 0  ;;  %vm129_vm1 = vcmp.lt.s32.totalorder %v128_v30, 2 }
  0xad   :  { %v1144_v30 = vpack.c.bf16 %v665_v29, %v664_v28 }
  0xae   :  { %v947_v6 = vadd.s32 4294967294, %v102_v5 }
  0xb0   :  { %vm948_vm7 = vcmp.lt.s32.totalorder %v947_v6, 0 }
  0xb1   :  { %v105_v8 = vsel %vm948_vm7, 0, %v947_v6 }
  0xb2   :  { %v106_v10 = vsub.s32 32, %v105_v8  ;;  %v110_v11 = vsub.s32 4294967266, %v105_v8  ;;  %v107_v13 = vshll.u32 %v98_v1, %v105_v8  ;;  %v495_v8 = vld [vmem:[%s1466_s3 + $0x60] sm:$0xff] }
  0xb4   :  { %v108_v14 = vshrl.u32 %v90_v9, %v106_v10  ;;  %v111_v15 = vadd.s32 127, %v110_v11  ;;  %v496_v9 = vld [vmem:[%s1466_s3 + $0x68] sm:$0xff] }
  0xb6   :  { %v109_v16 = vor.u32 %v108_v14, %v107_v13  ;;  %v112_v17 = vshll.u32 %v111_v15, 23  ;;  %v1132_v13 = vpack.c.bf16 %v496_v9, %v495_v8  ;;  %v497_v15 = vld [vmem:[%s1466_s3 + $0x70] sm:$0xff] }
  0xb8   :  { %v113_v18 = vor.u32 4788187, %v112_v17  ;;  %v116_v20 = vcvt.s32.f32 %v109_v16  ;;  %v498_v16 = vld [vmem:[%s1466_s3 + $0x78] sm:$0xff] }
  0xb9   :  { %v1135_v17 = vpack.c.bf16 %v498_v16, %v497_v15  ;;  %v854_v16 = vld [vmem:[%s1466_s3 + $0x110] sm:$0xff] }
  0xba   :  { %v114_v19 = vand.u32 2147483647, %v113_v18  ;;  %v492_v18 = vld [vmem:[%s1469_s0] sm:$0xff] }
  0xbc   :  { %v117_v21 = vmul.f32 %v116_v20, %v114_v19  ;;  %v956_v19 = vld [vmem:[%s1468_s4 + $0x1] ss:$0 sm:$0xff] }
  0xbe   :  { %v118_v23 = vxor.u32 2147483648, %v117_v21 }
  0xc0   :  { %v119_v24 = vsel %vm36_vm8, %v118_v23, %v117_v21 }
  0xc1   :  { %v122_v26 = vsel %vm35_vm9, %v1269_v7, %v119_v24  ;;  %v406_v7 = vld [vmem:[%s1466_s3 + $0x18] sm:$0xff] }
  0xc2   :  { %1191 = vcosq.f32 %v122_v26  ;;  %v1120_v43 = vpack.c.bf16 %v406_v7, %v405_v42 }
  0xc3   :  { %1193 = vsinq.f32 %v122_v26  ;;  %v663_v26 = vld [vmem:[%s1466_s3 + $0x88] sm:$0xff] }
  0xc4   :  { %v1141_v27 = vpack.c.bf16 %v663_v26, %v662_v25  ;;  %v963_v25 = vld [vmem:[%s1468_s4 + $0x4] ss:$0 sm:$0xff] }
  0xcc   :  { %v1192_v31 = vpop.eup %1191 }
  0xcd   :  { %v1194_v32 = vpop.eup %1193  ;;  %v134_v33 = vxor.u32 2147483648, %v1192_v31 }
  0xce   :  { %v131_v34 = vxor.u32 2147483648, %v1194_v32 }
  0xcf   :  { %v238_v35 = vsel %vm236_vm10, %v134_v33, %v1194_v32  ;;  %v135_v12 = vsel %vm133_vm12, %v134_v33, %v1194_v32  ;;  %v667_v32 = vld [vmem:[%s1466_s3 + $0xa8] sm:$0xff] }
  0xd0   :  { %v235_v36 = vsel %vm233_vm13, %v1192_v31, %v131_v34  ;;  %v132_v37 = vsel %vm130_vm14, %v1192_v31, %v131_v34  ;;  %v666_v31 = vld [vmem:[%s1466_s3 + $0xa0] sm:$0xff]  ;;  %v668_v34 = vld [vmem:[%s1466_s3 + $0xb0] sm:$0xff] }
  0xd1   :  { %v239_v38 = vsel %vm232_vm15, %v235_v36, %v238_v35  ;;  %v136_v39 = vsel %vm129_vm1, %v132_v37, %v135_v12  ;;  %v1147_v33 = vpack.c.bf16 %v667_v32, %v666_v31  ;;  %v669_v35 = vld [vmem:[%s1466_s3 + $0xb8] sm:$0xff]  ;;  %v960_v37 = vld [vmem:[%s1468_s4 + $0x2] ss:$0 sm:$0xff] }
  0xd2   :  { %v240_v40 = vsel %vm126_vm2, nan, %v239_v38  ;;  %v137_v41 = vsel %vm126_vm2, nan, %v136_v39  ;;  %v1150_v12 = vpack.c.bf16 %v669_v35, %v668_v34 }
  0xd3   :  { %1018 = vmatmul.mubr.msk.f32.vlgmr.msra.gmra.mrb[0].mxu0 %vm243_vm11, %v240_v40  ;;  %1023 = vmatmul.mubr.msk.f32.vlgmr.msra.gmra.mrb[0].mxu1 %vm243_vm11, %v137_v41 }
  0xd4   :  { %1041 = vmatprep.mubr.msk.f32.mxu0 %vm1213_vm0, %v1212_v2  ;;  %1059 = vmatprep.mubr.msk.f32.mxu1 %vm1213_vm0, %v1212_v2 }
  0xd5   :  { %1121 = vmatpush3.bf16.msra.mxu0 %v1120_v43  ;;  %1139 = vmatpush3.bf16.msra.mxu1 %v1138_v56  ;;  %v762_v56 = vld [vmem:[%s1466_s3 + $0xe8] sm:$0xff] }
  0xd6   :  { %1122 = vmatprep.subr.bf16.mxu0 %v1220_v44  ;;  %1140 = vmatprep.subr.bf16.mxu1 %v1220_v44 }
  0xd8   :  { %1060 = vmatmul.mubr.msk.f32.vlgmr.msra.gmra.mrb[2].mxu1 %vm573_vm4, %v492_v18 }
  0xd9   :  { %1124 = vmatpush3.bf16.msra.mxu0 %v1123_v47  ;;  %1078 = vmatprep.mubr.msk.f32.mxu1 %vm1213_vm0, %v1212_v2 }
  0xda   :  { %1125 = vmatprep.subr.bf16.mxu0 %v1220_v44  ;;  %1142 = vmatpush3.bf16.msra.mxu1 %v1141_v27 }
  0xdb   :  { %1143 = vmatprep.subr.bf16.mxu1 %v1220_v44 }
  0xdd   :  { %1127 = vmatpush3.bf16.msra.mxu0 %v1126_v50  ;;  %v757_v50 = vld [vmem:[%s1466_s3 + $0xc0] sm:$0xff] }
  0xde   :  { %1128 = vmatprep.subr.bf16.mxu0 %v1220_v44  ;;  %1145 = vmatpush3.bf16.msra.mxu1 %v1144_v30  ;;  %v1153_v52 = vpack.c.bf16 %v758_v51, %v757_v50 }
  0xdf   :  { %1146 = vmatprep.subr.bf16.mxu1 %v1220_v44 }
  0xe1   :  { %1130 = vmatpush3.bf16.msra.mxu0 %v1129_v53  ;;  %v759_v53 = vld [vmem:[%s1466_s3 + $0xd0] sm:$0xff] }
  0xe2   :  { %1131 = vmatprep.subr.bf16.mxu0 %v1220_v44  ;;  %1148 = vmatpush3.bf16.msra.mxu1 %v1147_v33 }
  0xe3   :  { %1149 = vmatprep.subr.bf16.mxu1 %v1220_v44 }
  0xe6   :  { %1151 = vmatpush3.bf16.msra.mxu1 %v1150_v12 }
  0xe7   :  { %1164 = vmatprep.subr.bf16.mxu1 %v1220_v44 }
 0x1a6   :  { %v313_v57 = vpop.f32.mrb[0].mxu0  ;;  %v386_v58 = vpop.f32.mrb[0].mxu1 }
 0x1a7   :  { %v387_v60 = vadd.f32 %v386_v58, %v313_v57  ;;  %v1019_v61 = vpop.f32.mrb[1].mxu0  ;;  %v1024_v62 = vpop.f32.mrb[1].mxu1  ;;  %v1159_v57 = vpack.c.bf16 %v762_v56, %v761_v55  ;;  %v763_v58 = vld [vmem:[%s1466_s3 + $0xf0] sm:$0xff] }
 0x1a8   :  { %v961_v61 = vld [vmem:[%s1468_s4 + $0x3] ss:$0 sm:$0xff] }
 0x1a9   :  { %v395_v63 = vadd.f32 %v955_v59, %v387_v60  ;;  %v764_v59 = vld [vmem:[%s1466_s3 + $0xf8] sm:$0xff] }
 0x1aa   :  { %v1162_v60 = vpack.c.bf16 %v764_v59, %v763_v58 }
 0x1ab   :  { %v396_v0 = vmin.f32 %v395_v63, 30.0  ;;  %v643_v23 = vpop.f32.mrb[2].mxu1 }
 0x1ac   :  { %v1061_v24 = vpop.f32.mrb[3].mxu1 }
 0x1ad   :  { %v397_v1 = vmul.f32 1.442695, %v396_v0 }
 0x1af   :  { %1195 = vpow2.f32 %v397_v1 }
 0x1b9   :  { %v1196_v3 = vpop.eup %1195 }
 0x1ba   :  { %v399_v4 = vadd.f32 2.0, %v1196_v3 }
 0x1bc   :  { %v400_v5 = vmul.f32 %v1196_v3, %v399_v4 }
 0x1be   :  { %v402_v6 = vadd.f32 2.0, %v400_v5  ;;  %v401_v10 = vmul.f32 %v400_v5, %v395_v63 }
 0x1c0   :  { %1197 = vrcp.f32 %v402_v6 }
 0x1ca   :  { %v1198_v11 = vpop.eup %1197 }
 0x1cb   :  { %v404_v14 = vmul.f32 %v1198_v11, %v401_v10 }
 0x1cd   :  { %1042 = vmatmul.mubr.msk.f32.vlgmr.msra.gmra.mrb[2].mxu0 %vm418_vm3, %v404_v14  ;;  %v853_v14 = vld [vmem:[%s1466_s3 + $0x108] sm:$0xff] }
 0x1ce   :  { %1133 = vmatpush3.bf16.msra.mxu0 %v1132_v13  ;;  %1052 = vmatprep.mubr.msk.f32.mxu0 %vm1213_vm0, %v1212_v2  ;;  %v852_v13 = vld [vmem:[%s1466_s3 + $0x100] sm:$0xff] }
 0x1cf   :  { %1134 = vmatprep.subr.bf16.mxu0 %v1220_v44  ;;  %v1165_v15 = vpack.c.bf16 %v853_v14, %v852_v13 }
 0x1d2   :  { %1136 = vmatpush3.bf16.msra.mxu0 %v1135_v17  ;;  %v855_v17 = vld [vmem:[%s1466_s3 + $0x118] sm:$0xff] }
 0x1d3   :  { %1152 = vmatprep.subr.bf16.mxu0 %v1220_v44  ;;  %v1168_v18 = vpack.c.bf16 %v855_v17, %v854_v16 }
 0x2a0   :  { %v488_v20 = vpop.f32.mrb[2].mxu0 }
 0x2a1   :  { %v489_v21 = vadd.f32 %v956_v19, %v488_v20  ;;  %v1043_v22 = vpop.f32.mrb[3].mxu0  ;;  %v856_v19 = vld [vmem:[%s1466_s3 + $0x120] sm:$0xff]  ;;  %v857_v20 = vld [vmem:[%s1466_s3 + $0x128] sm:$0xff] }
 0x2a2   :  { %v858_v22 = vld [vmem:[%s1466_s3 + $0x130] sm:$0xff] }
 0x2a3   :  { %1053 = vmatmul.mubr.msk.f32.vlgmr.msra.gmra.mrb[4].mxu0 %vm499_vm5, %v489_v21  ;;  %v1171_v21 = vpack.c.bf16 %v857_v20, %v856_v19 }
 0x2a4   :  { %1097 = vmatprep.mubr.msk.f32.mxu0 %vm1213_vm0, %v1212_v2  ;;  %1154 = vmatpush3.bf16.msra.mxu0 %v1153_v52 }
 0x2a5   :  { %1155 = vmatprep.subr.bf16.mxu0 %v1220_v44 }
 0x376   :  { %v569_v36 = vpop.f32.mrb[4].mxu0 }
 0x377   :  { %v644_v38 = vadd.f32 %v643_v23, %v569_v36  ;;  %v1054_v39 = vpop.f32.mrb[5].mxu0  ;;  %v859_v23 = vld [vmem:[%s1466_s3 + $0x138] sm:$0xff]  ;;  %v965_v36 = vld [vmem:[%s1468_s4 + $0x5] ss:$0 sm:$0xff] }
 0x378   :  { %v1174_v24 = vpack.c.bf16 %v859_v23, %v858_v22 }
 0x379   :  { %v652_v40 = vadd.f32 %v960_v37, %v644_v38 }
 0x37b   :  { %v653_v41 = vmin.f32 %v652_v40, 30.0 }
 0x37d   :  { %v654_v42 = vmul.f32 1.442695, %v653_v41 }
 0x37f   :  { %1199 = vpow2.f32 %v654_v42 }
 0x389   :  { %v1200_v7 = vpop.eup %1199 }
 0x38a   :  { %v656_v43 = vadd.f32 2.0, %v1200_v7 }
 0x38c   :  { %v657_v45 = vmul.f32 %v1200_v7, %v656_v43 }
 0x38e   :  { %v659_v46 = vadd.f32 2.0, %v657_v45  ;;  %v658_v47 = vmul.f32 %v657_v45, %v652_v40 }
 0x390   :  { %1201 = vrcp.f32 %v659_v46 }
 0x39a   :  { %v1202_v48 = vpop.eup %1201 }
 0x39b   :  { %v661_v49 = vmul.f32 %v1202_v48, %v658_v47 }
 0x39d   :  { %1079 = vmatmul.mubr.msk.f32.vlgmr.msra.gmra.mrb[4].mxu1 %vm418_vm3, %v661_v49 }
 0x39e   :  { %1116 = vmatprep.mubr.msk.f32.mxu1 %vm1213_vm0, %v1212_v2  ;;  %v760_v2 = vld [vmem:[%s1466_s3 + $0xd8] sm:$0xff]  ;;  %1166 = vmatpush3.bf16.msra.mxu1 %v1165_v15  ;;  %vm938_vm0 = vcmask 15360  }
 0x39f   :  { %v1156_v54 = vpack.c.bf16 %v760_v2, %v759_v53  ;;  %1167 = vmatprep.subr.bf16.mxu1 %v1220_v44 }
 0x3a1   :  { %1157 = vmatpush3.bf16.msra.mxu0 %v1156_v54 }
 0x3a2   :  { %1158 = vmatprep.subr.bf16.mxu0 %v1220_v44  ;;  %1169 = vmatpush3.bf16.msra.mxu1 %v1168_v18 }
 0x3a3   :  { %1170 = vmatprep.subr.bf16.mxu1 %v1220_v44 }
 0x3a5   :  { %1160 = vmatpush3.bf16.msra.mxu0 %v1159_v57 }
 0x3a6   :  { %1161 = vmatprep.subr.bf16.mxu0 %v1220_v44  ;;  %1172 = vmatpush3.bf16.msra.mxu1 %v1171_v21 }
 0x3a7   :  { %1173 = vmatprep.subr.bf16.mxu1 %v1220_v44 }
 0x3a9   :  { %1163 = vmatpush3.bf16.msra.mxu0 %v1162_v60 }
 0x3aa   :  { %1175 = vmatpush3.bf16.msra.mxu1 %v1174_v24 }
 0x470   :  { %v744_v62 = vpop.f32.mrb[4].mxu1 }
 0x471   :  { %v745_v63 = vadd.f32 %v961_v61, %v744_v62  ;;  %v1080_v0 = vpop.f32.mrb[5].mxu1 }
 0x473   :  { %v748_v1 = vmin.f32 %v745_v63, 30.0 }
 0x475   :  { %v749_v3 = vmul.f32 1.442695, %v748_v1 }
 0x477   :  { %1203 = vpow2.f32 %v749_v3 }
 0x481   :  { %v1204_v4 = vpop.eup %1203 }
 0x482   :  { %v751_v5 = vadd.f32 2.0, %v1204_v4 }
 0x484   :  { %v752_v6 = vmul.f32 %v1204_v4, %v751_v5 }
 0x486   :  { %v754_v8 = vadd.f32 2.0, %v752_v6  ;;  %v753_v9 = vmul.f32 %v752_v6, %v745_v63 }
 0x488   :  { %1205 = vrcp.f32 %v754_v8 }
 0x492   :  { %v1206_v10 = vpop.eup %1205 }
 0x493   :  { %v756_v11 = vmul.f32 %v1206_v10, %v753_v9 }
 0x495   :  { %1098 = vmatmul.mubr.msk.f32.vlgmr.msra.gmra.mrb[6].mxu0 %vm418_vm3, %v756_v11 }
 0x568   :  { %v839_v26 = vpop.f32.mrb[6].mxu0 }
 0x569   :  { %v840_v27 = vadd.f32 %v963_v25, %v839_v26  ;;  %v1099_v28 = vpop.f32.mrb[7].mxu0 }
 0x56b   :  { %v843_v29 = vmin.f32 %v840_v27, 30.0 }
 0x56d   :  { %v844_v30 = vmul.f32 1.442695, %v843_v29 }
 0x56f   :  { %1207 = vpow2.f32 %v844_v30 }
 0x579   :  { %v1208_v44 = vpop.eup %1207 }
 0x57a   :  { %v846_v31 = vadd.f32 2.0, %v1208_v44 }
 0x57c   :  { %v847_v32 = vmul.f32 %v1208_v44, %v846_v31 }
 0x57e   :  { %v849_v33 = vadd.f32 2.0, %v847_v32  ;;  %v848_v34 = vmul.f32 %v847_v32, %v840_v27 }
 0x580   :  { %1209 = vrcp.f32 %v849_v33 }
 0x58a   :  { %v1210_v35 = vpop.eup %1209 }
 0x58b   :  { %v851_v12 = vmul.f32 %v1210_v35, %v848_v34 }
 0x58d   :  { %1117 = vmatmul.mubr.msk.f32.vlgmr.msra.gmra.mrb[6].mxu1 %vm418_vm3, %v851_v12 }
 0x660   :  { %v934_v37 = vpop.f32.mrb[6].mxu1 }
 0x661   :  { %v935_v38 = vadd.f32 %v965_v36, %v934_v37  ;;  %v1118_v39 = vpop.f32.mrb[7].mxu1 }
 0x663   :  { %939 = vst.msk [vmem:[%s1470_s5] sm:$0xff] %vm938_vm0, %v935_v38 }

</bundles_post_ra>
